<compile_context>
chip_gen: v7x
topology: tpu7x:2x2x1
jax: 0.10.0
libtpu: 0.0.40
codegen_flags: <defaults>
</compile_context>

<pallas_src>
import jax
import jax.numpy as jnp
from jax.experimental import pallas as pl
from jax.experimental.pallas import tpu as pltpu


def _linear_relu_kernel(x_ref, wt_ref, b_ref, o_ref):
    # x_ref:  [tile_b, F_in]
    # wt_ref: [F_in, F_out]   (pre-transposed in the wrapper -> no in-kernel w.T)
    # b_ref:  [1, F_out]
    acc = jnp.dot(x_ref[...], wt_ref[...], preferred_element_type=jnp.float32)
    acc = acc + b_ref[...]          # bias loaded once per invocation, single VALU add
    o_ref[...] = jnp.maximum(acc, 0.0).astype(o_ref.dtype)


# Batches at or below this run as a single whole-array-resident kernel (no grid).
_SMALL_BATCH_MAX = 1024
# Row tile for the batch-tiled path (multiple of 8; tiny VMEM footprint at F=4,
# well under the 32 MiB scoped-VMEM default even on v7x).
_BATCH_TILE = 1024


def level4_forward(x, weight, bias):
    """relu(x @ weight.T + bias) as a Pallas TPU kernel.

    x:      [B, F_in]     float32
    weight: [F_out, F_in] float32   (PyTorch nn.Linear weight layout)
    bias:   [F_out]       float32
    """
    B, Fin = x.shape
    Fout = weight.shape[0]

    # One-time layout plumbing outside the kernel: [F_in, F_out] and [1, F_out].
    wt = weight.T
    bias2d = bias.reshape(1, Fout)

    if B <= _SMALL_BATCH_MAX:
        # Whole-array VMEM residency, no grid, no pipeline machinery: this size
        # is purely launch/DMA-latency bound.
        return pl.pallas_call(
            _linear_relu_kernel,
            out_shape=jax.ShapeDtypeStruct((B, Fout), x.dtype),
            in_specs=[
                pl.BlockSpec(memory_space=pltpu.MemorySpace.VMEM),
                pl.BlockSpec(memory_space=pltpu.MemorySpace.VMEM),
                pl.BlockSpec(memory_space=pltpu.MemorySpace.VMEM),
            ],
            out_specs=pl.BlockSpec(memory_space=pltpu.MemorySpace.VMEM),
        )(x, wt, bias2d)

    # Large-batch path: tile the batch axis; weight/bias stay resident across
    # the grid (their index_maps always return block (0, 0)).
    tb = _BATCH_TILE
    grid = (pl.cdiv(B, tb),)
    return pl.pallas_call(
        _linear_relu_kernel,
        out_shape=jax.ShapeDtypeStruct((B, Fout), x.dtype),
        grid_spec=pltpu.PrefetchScalarGridSpec(
            num_scalar_prefetch=0,
            grid=grid,
            in_specs=[
                pl.BlockSpec((tb, Fin), lambda i: (i, 0)),
                pl.BlockSpec((Fin, Fout), lambda i: (0, 0)),   # resident
                pl.BlockSpec((1, Fout), lambda i: (0, 0)),     # resident
            ],
            out_specs=pl.BlockSpec((tb, Fout), lambda i: (i, 0)),
        ),
        compiler_params=pltpu.CompilerParams(
            # Independent batch tiles -> "parallel" (shards across 2 TCs on v7x).
            dimension_semantics=("parallel",),
        ),
    )(x, wt, bias2d)


def _reference(x, weight, bias):
    return jnp.maximum(x @ weight.T + bias, 0.0)


if __name__ == "__main__":
    key = jax.random.PRNGKey(0)
    kx, kw, kb, kx2 = jax.random.split(key, 4)

    B, F = 8, 4  # Linear(4, 4); batch of 8 rows
    x = jax.random.normal(kx, (B, F), dtype=jnp.float32)

    # Deterministic synthetic parameters for nn.Linear(4, 4) (shapes/semantics
    # match PyTorch; exact init distribution is irrelevant).
    bound = 1.0 / jnp.sqrt(F)
    weight = jax.random.uniform(kw, (F, F), minval=-bound, maxval=bound,
                                dtype=jnp.float32)
    bias = jax.random.uniform(kb, (F,), minval=-bound, maxval=bound,
                              dtype=jnp.float32)

    # Small-batch (grid-less, whole-array VMEM) path.
    out = jax.block_until_ready(level4_forward(x, weight, bias))
    ref = _reference(x, weight, bias)
    assert out.shape == (B, F)
    assert jnp.allclose(out, ref, atol=1e-5, rtol=1e-5)

    # Also exercise the batch-tiled (large-batch) path.
    B_large = 4096
    x_large = jax.random.normal(kx2, (B_large, F), dtype=jnp.float32)
    out_l = jax.block_until_ready(level4_forward(x_large, weight, bias))
    ref_l = _reference(x_large, weight, bias)
    assert out_l.shape == (B_large, F)
    assert jnp.allclose(out_l, ref_l, atol=1e-5, rtol=1e-5)

    print("KERNEL_OK")
</pallas_src>

<mosaic_0001>
module attributes {stable_mosaic.version = 11 : i64} {
  func.func @_linear_relu_kernel(%arg0: memref<8x4xf32, #tpu.memory_space<vmem>>, %arg1: memref<4x4xf32, #tpu.memory_space<vmem>>, %arg2: memref<1x4xf32, #tpu.memory_space<vmem>>, %arg3: memref<8x4xf32, #tpu.memory_space<vmem>>) attributes {dimension_semantics = [], scalar_prefetch = 0 : i64, scratch_operands = 0 : i64, tpu.core_type = #tpu.core_type<tc>} {
    %c0 = arith.constant 0 : index
    %c0_0 = arith.constant 0 : index
    %0 = vector.load %arg0[%c0, %c0_0] : memref<8x4xf32, #tpu.memory_space<vmem>>, vector<8x4xf32>
    %c0_1 = arith.constant 0 : index
    %c0_2 = arith.constant 0 : index
    %1 = vector.load %arg1[%c0_1, %c0_2] : memref<4x4xf32, #tpu.memory_space<vmem>>, vector<4x4xf32>
    %cst = arith.constant dense<0.000000e+00> : vector<8x4xf32>
    %2 = tpu.matmul %0, %1, %cst {dimension_numbers = #tpu.dot_dimension_numbers<[1], [0], [0], [1], [0, 0, 1, 1], [], []>} : vector<8x4xf32>, vector<4x4xf32>, vector<8x4xf32> -> vector<8x4xf32>
    %c0_3 = arith.constant 0 : index
    %c0_4 = arith.constant 0 : index
    %3 = vector.load %arg2[%c0_3, %c0_4] : memref<1x4xf32, #tpu.memory_space<vmem>>, vector<1x4xf32>
    %4 = vector.broadcast %3 : vector<1x4xf32> to vector<8x4xf32>
    %5 = arith.addf %2, %4 : vector<8x4xf32>
    %cst_5 = arith.constant 0.000000e+00 : f32
    %6 = vector.broadcast %cst_5 : f32 to vector<8x4xf32>
    %7 = arith.maximumf %5, %6 : vector<8x4xf32>
    %c0_6 = arith.constant 0 : index
    %c0_7 = arith.constant 0 : index
    %8 = vector.load %arg3[%c0_6, %c0_7] : memref<8x4xf32, #tpu.memory_space<vmem>>, vector<8x4xf32>
    tpu.vector_store %arg3[%c0_6, %c0_7], %7 {strides = array<i32>} : memref<8x4xf32, #tpu.memory_space<vmem>>, vector<8x4xf32>,
    return
  }
}

</mosaic_0001>

<bundles_post_ra>
// kernel: tpu_custom_call.1
= control target key start
LH: loop header
LB: loop body
LE: loop exit
PB: predicated region body
PF: predicated region fallthrough
CT: control target
= control target key end

     0   :  { %vm27_vm0 = vcmask 1043456   ;;  %vm23_vm1 = vcmask 31744   ;;  %v119_v0 = vmov 0.0   ;;  %vm120_vm2 = vmmov 0   ;;  %s155_s1 = inlined_call_operand.vmem [shape: f32[4,4], index: 1, kind: input, shape index: {}]   ;;  %s156_s0 = inlined_call_operand.vmem [shape: f32[8,4], index: 0, kind: input, shape index: {}]   ;;  %s157_s2 = inlined_call_operand.vmem [shape: f32[1,4], index: 2, kind: input, shape index: {}]   ;;  %s158_s3 = inlined_call_operand.vmem [shape: f32[8,4], index: 3, kind: output, shape index: {}]  }
   0x1   :  { %112 = vmatprep.subr.mxu0 %v119_v0  ;;  %v15_v1 = vld [vmem:[%s155_s1] sm:$0xf]  ;;  %114 = vmatprep.mubr.msk.f32.mxu0 %vm120_vm2, %v119_v0 }
   0x2   :  { %v14_v2 = vld [vmem:[%s156_s0] sm:$0xff]  ;;  %113 = vmatpush3.msk.msra.mxu0 %vm27_vm0, %v15_v1 }
   0x3   :  { %115 = vmatmul.mubr.msk.f32.vlgmr.msra.gmra.mrb[0].mxu0 %vm23_vm1, %v14_v2  ;;  %v107_v3 = vld [vmem:[%s157_s2] ss:$0 sm:$0xff] }
  0xd6   :  { %v97_v4 = vpop.f32.mrb[0].mxu0 }
  0xd7   :  { %v98_v5 = vadd.f32 %v107_v3, %v97_v4  ;;  %v116_v6 = vpop.f32.mrb[1].mxu0 }
  0xd9   :  { %v101_v7 = vmax.f32 %v98_v5, 0.0 }
  0xdb   :  { %102 = vst.msk [vmem:[%s158_s3] sm:$0xff] %vm23_vm1, %v101_v7 }

</bundles_post_ra>
